<compile_context>
chip_gen: v6e
topology: v6e:2x2x1
jax: 0.10.0
libtpu: 0.0.40
codegen_flags: <defaults>
</compile_context>

<pallas_src>
import functools

import jax
import jax.numpy as jnp
from jax.experimental import pallas as pl
from jax.experimental.pallas import tpu as pltpu

_LANES = 128
_SUBLANES = 16          # multiple-of-16 rows is layout-safe for f32/bf16/fp16
_MAX_TILE_ROWS = 4096   # 4096 x 128 x 4 B = 2 MiB per block (4 MiB dbl-buffered)


def _round_up(x, m):
    return ((x + m - 1) // m) * m


def _to_lane_dense_2d(x, pad_value):
    """Flatten, minimally pad (< 16*128 elements) and reshape to (rows, 128).

    Kept in the input's native dtype (the kernel upcasts to f32).  The pad
    value is chosen so padded elements contribute exactly zero, keeping the
    kernel mask-free for in-array padding.
    """
    flat = jnp.ravel(x)
    n = flat.shape[0]
    rows = _round_up(max(pl.cdiv(n, _LANES), 1), _SUBLANES)
    pad = rows * _LANES - n
    if pad:
        flat = jnp.pad(flat, (0, pad), constant_values=pad_value)
    return flat.reshape(rows, _LANES)


def _fused_loss_kernel(rmse_ref, w_ref, o_ref, acc_ref, *,
                       thr, inv_n, mu, lambda_, tile_rows, valid_rows):
    step = pl.program_id(0)

    @pl.when(step == 0)
    def _():
        acc_ref[...] = jnp.zeros_like(acc_ref)

    # --- per-step work: elementwise + per-vreg adds only (VPU) -------------
    x = rmse_ref[...].astype(jnp.float32)          # (tile_rows, 128)
    contrib = jnp.abs(x - thr)
    if valid_rows % tile_rows != 0:
        # Ragged last tile reads past the array: mask out-of-bounds rows.
        row = (step * tile_rows
               + jax.lax.broadcasted_iota(jnp.int32, (tile_rows, 1), 0))
        contrib = jnp.where(row < valid_rows, contrib, 0.0)
    # Fold the tile into a resident (8, 128) accumulator with pure VPU adds;
    # the cross-lane (XLU) reduce is deferred to the finalize step below.
    acc_ref[...] += jnp.sum(
        contrib.reshape(tile_rows // 8, 8, _LANES), axis=0)

    # --- finalize: single XLU reduce + tiny regularizer + combine ----------
    @pl.when(step == pl.num_programs(0) - 1)
    def _():
        abs_dev = jnp.sum(acc_ref[...], axis=1, keepdims=True)   # (8, 1)
        abs_dev = jnp.sum(abs_dev, axis=0, keepdims=True)        # (1, 1)

        w = w_ref[...].astype(jnp.float32)                       # resident, tiny
        reg = jnp.log(1.0 + jnp.exp(-jnp.abs(w)))
        reg = jnp.sum(reg, axis=1, keepdims=True)
        reg = jnp.sum(reg, axis=0, keepdims=True)                # (1, 1)

        o_ref[...] = mu * (abs_dev * inv_n) + lambda_ * reg


def kitsune_loss(rmse, weight, *, lambda_, ad_threshold):
    """Pallas implementation of Distribution_Transformer_Loss_Kitsune.forward."""
    mu = 1.0 / 3.0
    thr = float(ad_threshold)
    n = rmse.shape[0]          # matches torch's rmse.size(0); rmse expected 1-D

    rmse2d = _to_lane_dense_2d(rmse, thr)    # |pad - thr| == 0
    w2d = _to_lane_dense_2d(weight, 1e4)     # log(1 + exp(-1e4)) == 0

    rows, _ = rmse2d.shape
    tile_rows = min(_MAX_TILE_ROWS, rows)    # multiple of 16 by construction
    num_tiles = pl.cdiv(rows, tile_rows)

    kernel = functools.partial(
        _fused_loss_kernel, thr=thr, inv_n=1.0 / n, mu=mu,
        lambda_=float(lambda_), tile_rows=tile_rows, valid_rows=rows)

    # TODO(synk): for very large inputs on v7x, split the row range over a
    # leading size-2 "parallel" grid axis (one per TensorCore) with per-core
    # partial outputs combined outside the kernel.
    out = pl.pallas_call(
        kernel,
        out_shape=jax.ShapeDtypeStruct((1, 1), jnp.float32),
        grid_spec=pltpu.PrefetchScalarGridSpec(
            num_scalar_prefetch=0,
            grid=(num_tiles,),
            in_specs=[
                pl.BlockSpec((tile_rows, _LANES), lambda i: (i, 0)),
                pl.BlockSpec(w2d.shape, lambda i: (0, 0)),  # resident: one DMA
            ],
            out_specs=pl.BlockSpec((1, 1), lambda i: (0, 0)),
            scratch_shapes=[pltpu.VMEM((8, _LANES), jnp.float32)],
        ),
        compiler_params=pltpu.CompilerParams(
            # The single grid axis carries resident accumulator/output blocks,
            # so it is a sequential reduction axis.
            dimension_semantics=("arbitrary",)),
    )(rmse2d, w2d)
    return out[0, 0]


def _reference(rmse, weight, lambda_, ad_threshold):
    """Plain-JAX reference mirroring the PyTorch forward exactly."""
    mu = 1.0 / 3.0
    n = rmse.shape[0]
    loss_wrong = jnp.sum(
        jnp.where(rmse > ad_threshold, rmse - ad_threshold, 0.0)) / n
    loss_correct = jnp.sum(
        jnp.where(rmse <= ad_threshold, ad_threshold - rmse, 0.0)) / n
    reg = jnp.sum(jnp.log(1.0 + jnp.exp(-jnp.abs(weight))))
    return mu * (loss_wrong + loss_correct) + lambda_ * reg


if __name__ == "__main__":
    key = jax.random.PRNGKey(0)
    k_rmse, k_w = jax.random.split(key)

    n = 200   # per-sample RMSE vector (deliberately not a multiple of 128)
    d = 32    # distribution-transformer weights: (3, d)
    rmse = 0.5 * jnp.abs(jax.random.normal(k_rmse, (n,), dtype=jnp.float32))
    weight = 0.01 * jax.random.normal(k_w, (3, d), dtype=jnp.float32)

    lambda_ = 0.05
    ad_threshold = 0.3

    loss = kitsune_loss(rmse, weight, lambda_=lambda_, ad_threshold=ad_threshold)
    loss = jax.block_until_ready(loss)

    ref = _reference(rmse, weight, lambda_, ad_threshold)
    assert loss.shape == ()
    assert jnp.allclose(loss, ref, atol=1e-4, rtol=1e-5), (loss, ref)

    print("KERNEL_OK")
</pallas_src>

<mosaic_0001>
module attributes {stable_mosaic.version = 11 : i64} {
  func.func @_fused_loss_kernel(%arg0: i32, %arg1: memref<16x128xf32, #tpu.memory_space<vmem>>, %arg2: memref<16x128xf32, #tpu.memory_space<vmem>>, %arg3: memref<1x1xf32, #tpu.memory_space<vmem>>, %arg4: memref<8x128xf32, #tpu.memory_space<vmem>>) attributes {dimension_semantics = [#tpu.dimension_semantics<arbitrary>], iteration_bounds = array<i64: 1>, scalar_prefetch = 0 : i64, scratch_operands = 1 : i64, tpu.core_type = #tpu.core_type<tc>, window_params = [{transform_indices = @transform_0, window_bounds = array<i64: 16, 128>}, {pipeline_mode = #tpu.pipeline_mode<synchronous>, transform_indices = @transform_1, window_bounds = array<i64: 16, 128>}, {pipeline_mode = #tpu.pipeline_mode<synchronous>, transform_indices = @transform_2, window_bounds = array<i64: 1, 1>}]} {
    %c0_i32 = arith.constant 0 : i32
    %0 = arith.cmpi eq, %arg0, %c0_i32 : i32
    %1 = arith.extui %0 : i1 to i32
    %c0_i32_0 = arith.constant 0 : i32
    %2 = arith.cmpi ne, %1, %c0_i32_0 : i32
    scf.if %2 {
      %cst_9 = arith.constant 0.000000e+00 : f32
      %15 = vector.broadcast %cst_9 : f32 to vector<8x128xf32>
      %c0_10 = arith.constant 0 : index
      %c0_11 = arith.constant 0 : index
      %16 = vector.load %arg4[%c0_10, %c0_11] : memref<8x128xf32, #tpu.memory_space<vmem>>, vector<8x128xf32>
      tpu.vector_store %arg4[%c0_10, %c0_11], %15 {strides = array<i32>} : memref<8x128xf32, #tpu.memory_space<vmem>>, vector<8x128xf32>,
    } else {
    }
    %c0 = arith.constant 0 : index
    %c0_1 = arith.constant 0 : index
    %3 = vector.load %arg1[%c0, %c0_1] : memref<16x128xf32, #tpu.memory_space<vmem>>, vector<16x128xf32>
    %cst = arith.constant 3.000000e-01 : f32
    %4 = vector.broadcast %cst : f32 to vector<16x128xf32>
    %5 = arith.subf %3, %4 : vector<16x128xf32>
    %6 = math.absf %5 : vector<16x128xf32>
    %c0_2 = arith.constant 0 : index
    %c0_3 = arith.constant 0 : index
    %7 = vector.load %arg4[%c0_2, %c0_3] : memref<8x128xf32, #tpu.memory_space<vmem>>, vector<8x128xf32>
    %8 = vector.shape_cast %6 : vector<16x128xf32> to vector<2x8x128xf32>
    %cst_4 = arith.constant dense<0.000000e+00> : vector<8x128xf32>
    %9 = vector.multi_reduction <add>, %8, %cst_4 [0] : vector<2x8x128xf32> to vector<8x128xf32>
    %10 = arith.addf %7, %9 : vector<8x128xf32>
    %c0_5 = arith.constant 0 : index
    %c0_6 = arith.constant 0 : index
    %11 = vector.load %arg4[%c0_5, %c0_6] : memref<8x128xf32, #tpu.memory_space<vmem>>, vector<8x128xf32>
    tpu.vector_store %arg4[%c0_5, %c0_6], %10 {strides = array<i32>} : memref<8x128xf32, #tpu.memory_space<vmem>>, vector<8x128xf32>,
    %c0_i32_7 = arith.constant 0 : i32
    %12 = arith.cmpi eq, %arg0, %c0_i32_7 : i32
    %13 = arith.extui %12 : i1 to i32
    %c0_i32_8 = arith.constant 0 : i32
    %14 = arith.cmpi ne, %13, %c0_i32_8 : i32
    scf.if %14 {
      %c0_9 = arith.constant 0 : index
      %c0_10 = arith.constant 0 : index
      %15 = vector.load %arg4[%c0_9, %c0_10] : memref<8x128xf32, #tpu.memory_space<vmem>>, vector<8x128xf32>
      %cst_11 = arith.constant dense<0.000000e+00> : vector<8xf32>
      %16 = vector.multi_reduction <add>, %15, %cst_11 [1] : vector<8x128xf32> to vector<8xf32>
      %17 = vector.shape_cast %16 : vector<8xf32> to vector<8x1xf32>
      %cst_12 = arith.constant dense<0.000000e+00> : vector<1xf32>
      %18 = vector.multi_reduction <add>, %17, %cst_12 [0] : vector<8x1xf32> to vector<1xf32>
      %19 = vector.shape_cast %18 : vector<1xf32> to vector<1x1xf32>
      %c0_13 = arith.constant 0 : index
      %c0_14 = arith.constant 0 : index
      %20 = vector.load %arg2[%c0_13, %c0_14] : memref<16x128xf32, #tpu.memory_space<vmem>>, vector<16x128xf32>
      %21 = math.absf %20 : vector<16x128xf32>
      %cst_15 = arith.constant 0.000000e+00 : f32
      %22 = vector.broadcast %cst_15 : f32 to vector<16x128xf32>
      %23 = arith.subf %22, %21 : vector<16x128xf32>
      %24 = math.exp %23 : vector<16x128xf32>
      %cst_16 = arith.constant 1.000000e+00 : f32
      %25 = vector.broadcast %cst_16 : f32 to vector<16x128xf32>
      %26 = arith.addf %25, %24 : vector<16x128xf32>
      %27 = math.log %26 : vector<16x128xf32>
      %cst_17 = arith.constant dense<0.000000e+00> : vector<16xf32>
      %28 = vector.multi_reduction <add>, %27, %cst_17 [1] : vector<16x128xf32> to vector<16xf32>
      %29 = vector.shape_cast %28 : vector<16xf32> to vector<16x1xf32>
      %cst_18 = arith.constant dense<0.000000e+00> : vector<1xf32>
      %30 = vector.multi_reduction <add>, %29, %cst_18 [0] : vector<16x1xf32> to vector<1xf32>
      %31 = vector.shape_cast %30 : vector<1xf32> to vector<1x1xf32>
      %cst_19 = arith.constant 5.000000e-03 : f32
      %32 = vector.broadcast %cst_19 : f32 to vector<1x1xf32>
      %33 = arith.mulf %19, %32 : vector<1x1xf32>
      %cst_20 = arith.constant 0.333333343 : f32
      %34 = vector.broadcast %cst_20 : f32 to vector<1x1xf32>
      %35 = arith.mulf %34, %33 : vector<1x1xf32>
      %cst_21 = arith.constant 5.000000e-02 : f32
      %36 = vector.broadcast %cst_21 : f32 to vector<1x1xf32>
      %37 = arith.mulf %36, %31 : vector<1x1xf32>
      %38 = arith.addf %35, %37 : vector<1x1xf32>
      %c0_22 = arith.constant 0 : index
      %c0_23 = arith.constant 0 : index
      %39 = vector.load %arg3[%c0_22, %c0_23] : memref<1x1xf32, #tpu.memory_space<vmem>>, vector<1x1xf32>
      tpu.vector_store %arg3[%c0_22, %c0_23], %38 {strides = array<i32>} : memref<1x1xf32, #tpu.memory_space<vmem>>, vector<1x1xf32>,
    } else {
    }
    return
  }
  func.func @transform_0(%arg0: i32) -> (i32, i32) {
    %c0_i32 = arith.constant 0 : i32
    %c0_i32_0 = arith.constant 0 : i32
    return %arg0, %c0_i32 : i32, i32
  }
  func.func @transform_1(%arg0: i32) -> (i32, i32) {
    %c0_i32 = arith.constant 0 : i32
    %c0_i32_0 = arith.constant 0 : i32
    %c0_i32_1 = arith.constant 0 : i32
    return %c0_i32, %c0_i32_0 : i32, i32
  }
  func.func @transform_2(%arg0: i32) -> (i32, i32) {
    %c0_i32 = arith.constant 0 : i32
    %c0_i32_0 = arith.constant 0 : i32
    %c0_i32_1 = arith.constant 0 : i32
    return %c0_i32, %c0_i32_0 : i32, i32
  }
}

</mosaic_0001>

<bundles_post_ra>
// kernel: tpu_custom_call.1
= control target key start
LH: loop header
LB: loop body
LE: loop exit
PB: predicated region body
PF: predicated region fallthrough
CT: control target
= control target key end

     0   :  { %7 = vsyncpa [#allocation4], 0  ;;  %s226_s0 = inlined_call_operand.hbm [shape: f32[16,128], index: 0, kind: input, shape index: {}]   ;;  %s227_s1 = inlined_call_operand.hbm [shape: f32[16,128], index: 1, kind: input, shape index: {}]   ;;  %s228_s2 = inlined_call_operand.hbm [shape: f32[1,1], index: 2, kind: output, shape index: {}]  }
   0x1   :  { %8 = vsyncpa [#allocation7], 0 }
   0x2   :  { %9 = vsyncpa [#allocation5], 0  ;;  %s197_s9 = smov [#allocation3]  }
   0x3   :  { %s15_s10 = sshll.u32 %s197_s9, 4  ;;  %s16_s10 = int_to_ptr.vmem [resolvable:$true] %s15_s10 }
   0x4   :  { %s139_s11 = scalar_lea.vmem %s16_s10, 256  ;;  %p144_p1 = scmp.lt.s32.totalorder %s16_s10, %s16_s10 }
   0x5   :  { %p140_p0 = scmp.ne.s32.totalorder %s16_s10, %s139_s11  ;;  %p145_p2 = scmp.lt.s32.totalorder %s139_s11, %s139_s11 }
   0x7   :  { %p146_p3 = por %p145_p2, %p144_p1 }
   0x9   :  { %p147_p4 = pnand %p146_p3, %p140_p0 }
   0xb   :  { %150 = shalt.err (!%p147_p4)
}
   0xc   :  { %s198_s12 = smov 128   ;;  %s199_s13 = smov 8  }
   0xd   :  { %21 = dma.hbm_to_vmem [thread:$0]  %s226_s0, 256, %s16_s10, [#allocation4], %s198_s12, %s198_s12, %s199_s13  }
   0xe   :  { %s200_s16 = smov [#allocation6]  }
   0xf   :  { %s27_s17 = sshll.u32 %s200_s16, 4  ;;  %s28_s17 = int_to_ptr.vmem [resolvable:$true] %s27_s17 }
  0x10   :  { %s159_s18 = scalar_lea.vmem %s28_s17, 256  ;;  %p164_p6 = scmp.lt.s32.totalorder %s28_s17, %s28_s17 }
  0x11   :  { %p160_p5 = scmp.ne.s32.totalorder %s28_s17, %s159_s18  ;;  %p165_p7 = scmp.lt.s32.totalorder %s159_s18, %s159_s18 }
  0x13   :  { %p166_p8 = por %p165_p7, %p164_p6 }
  0x15   :  { %p167_p9 = pnand %p166_p8, %p160_p5 }
  0x17   :  { %170 = shalt.err (!%p167_p9)
}
  0x18   :  { %33 = dma.hbm_to_vmem [thread:$0]  %s227_s1, 256, %s28_s17, [#allocation7], %s198_s12, %s198_s12, %s199_s13  }
  0x19   :  { %191 = dma.done.wait [#allocation4], 256  }
  0x1a   :  { %192 = vsyncadd [#allocation4], 4294967040 }
  0x1b   :  { %193 = dma.done.wait [#allocation7], 256  }
  0x1c   :  { %194 = vsyncadd [#allocation7], 4294967040  ;;  %v45_v0 = vld [vmem:[#allocation3] sm:$0xff]  ;;  %v46_v1 = vld [vmem:[#allocation3 + $0x8] sm:$0xff]  ;;  %s201_s0 = smov [#allocation8]   ;;  %vm98_vm0 = vcmask 0  }
  0x1d   :  { %v68_v2 = vld [vmem:[#allocation6 + $0x8] sm:$0xff]  ;;  %v116_v3 = vadd.f32 -0.3, %v45_v0  ;;  %v117_v4 = vadd.f32 -0.3, %v46_v1  ;;  %v67_v6 = vld [vmem:[#allocation6] sm:$0xff] }
  0x1e   :  { %v70_v5 = vand.u32 2147483647, %v68_v2  ;;  %v69_v10 = vand.u32 2147483647, %v67_v6  ;;  %s106_s1 = sshll.u32 %s201_s0, 4  ;;  %s107_s1 = int_to_ptr.vmem [resolvable:$true] %s106_s1 }
  0x1f   :  { %v49_v7 = vand.u32 2147483647, %v116_v3  ;;  %v50_v8 = vand.u32 2147483647, %v117_v4  ;;  %s171_s21 = scalar_lea.vmem %s107_s1, 16  ;;  %s175_s22 = scalar_lea.vmem %s107_s1, 32 }
  0x20   :  { %v72_v9 = vsub.f32 0.0, %v70_v5  ;;  %v71_v13 = vsub.f32 0.0, %v69_v10  ;;  %p172_p10 = scmp.ne.s32.totalorder %s107_s1, %s171_s21  ;;  %p176_p11 = scmp.lt.s32.totalorder %s107_s1, %s107_s1 }
  0x21   :  { %v52_v11 = vadd.f32 %v50_v8, %v49_v7  ;;  %p177_p12 = scmp.lt.s32.totalorder %s175_s22, %s171_s21 }
  0x22   :  { %v75_v12 = vmul.f32 1.442695, %v72_v9  ;;  %v73_v14 = vmul.f32 1.442695, %v71_v13 }
  0x23   :  { %59 = vadd.xlane.f32.xlu0 %v52_v11  ;;  %p178_p13 = por %p177_p12, %p176_p11 }
  0x24   :  { %123 = vpow2.f32 %v75_v12 }
  0x25   :  { %125 = vpow2.f32 %v73_v14  ;;  %p179_p0 = pnand %p178_p13, %p172_p10 }
  0x31   :  { %v124_v15 = vpop.eup %123 }
  0x32   :  { %v78_v16 = vadd.f32 1.0, %v124_v15  ;;  %v126_v17 = vpop.eup %125 }
  0x33   :  { %v77_v18 = vadd.f32 1.0, %v126_v17 }
  0x34   :  { %127 = vlog2.f32 %v78_v16 }
  0x35   :  { %129 = vlog2.f32 %v77_v18 }
  0x41   :  { %v128_v19 = vpop.eup %127 }
  0x42   :  { %v82_v20 = vmul.f32 0.6931472, %v128_v19  ;;  %v130_v21 = vpop.eup %129 }
  0x43   :  { %v80_v22 = vmul.f32 0.6931472, %v130_v21 }
  0x44   :  { %85 = vadd.xlane.f32.xlu1 %v82_v20 }
  0x45   :  { %83 = vadd.xlane.f32.xlu0 %v80_v22 }
  0xac   :  { %v60_v23 = vpop.xlane.xlu0 %59 }
  0xad   :  { %v61_v24 = vrot.slane %v60_v23, 4 }
  0xaf   :  { %v62_v25 = vadd.f32 %v61_v24, %v60_v23 }
  0xb1   :  { %v63_v26 = vrot.slane %v62_v25, 2 }
  0xb3   :  { %v64_v28 = vadd.f32 %v63_v26, %v62_v25 }
  0xb5   :  { %v65_v31 = vrot.slane %v64_v28, 1 }
  0xb7   :  { %v66_v34 = vadd.f32 %v65_v31, %v64_v28 }
  0xb9   :  { %v94_v37 = vmul.f32 0.005, %v66_v34 }
  0xbb   :  { %v95_v40 = vmul.f32 0.33333334, %v94_v37 }
  0xcd   :  { %v86_v27 = vpop.xlane.xlu1 %85 }
  0xce   :  { %v84_v29 = vpop.xlane.xlu0 %83 }
  0xcf   :  { %v87_v30 = vadd.f32 %v86_v27, %v84_v29 }
  0xd1   :  { %v88_v32 = vrot.slane %v87_v30, 4 }
  0xd3   :  { %v89_v33 = vadd.f32 %v88_v32, %v87_v30 }
  0xd5   :  { %v90_v35 = vrot.slane %v89_v33, 2 }
  0xd7   :  { %v91_v36 = vadd.f32 %v90_v35, %v89_v33 }
  0xd9   :  { %v92_v38 = vrot.slane %v91_v36, 1 }
  0xdb   :  { %v93_v39 = vadd.f32 %v92_v38, %v91_v36 }
  0xdd   :  { %v96_v41 = vmul.f32 0.05, %v93_v39 }
  0xdf   :  { %v97_v42 = vadd.f32 %v96_v41, %v95_v40 }
  0xe1   :  { %99 = vst.msk [vmem:[#allocation8] sm:$0x1] %vm98_vm0, %v97_v42 }
  0xe2   :  { %182 = shalt.err (!%p179_p0)
}
  0xe3   :  { %109 = dma.vmem_to_hbm [thread:$0]  %s107_s1, 16, %s228_s2, [#allocation5]  }
  0xe4   :  { %195 = dma.done.wait [#allocation5], 16  }
  0xe5   :  { %196 = vsyncadd [#allocation5], 4294967280 }
  0xe6   :  { %113 = vsyncpa [#allocation4], 1 }
  0xe7   :  { %114 = vsyncpa [#allocation7], 1 }
  0xe8   :  { %115 = vsyncpa [#allocation5], 1 }

</bundles_post_ra>
